<compile_context>
chip_gen: v7x
topology: tpu7x:2x2x1
jax: 0.10.0
libtpu: 0.0.40
codegen_flags: <defaults>
</compile_context>

<pallas_src>
import functools

import jax
import jax.numpy as jnp
from jax.experimental import pallas as pl
from jax.experimental.pallas import tpu as pltpu


def _round_up(n, m):
    return ((n + m - 1) // m) * m


def policy_mlp_kernel(x_ref, w1_ref, b1_ref, w2_ref, b2_ref, w3_ref, b3_ref, o_ref):
    # In-kernel bf16 cast of x (rides the otherwise-idle VPU slot; saves an HBM pass).
    x = x_ref[...].astype(jnp.bfloat16)
    # fc1 + relu  (bf16 MXU inputs -> f32 accumulation, bias-add/ReLU in f32)
    h1 = jnp.dot(x, w1_ref[...], preferred_element_type=jnp.float32)
    h1 = jnp.maximum(h1 + b1_ref[...], 0.0)
    # fc2 + relu
    h2 = jnp.dot(h1.astype(jnp.bfloat16), w2_ref[...], preferred_element_type=jnp.float32)
    h2 = jnp.maximum(h2 + b2_ref[...], 0.0)
    # fc3
    logits = jnp.dot(h2.astype(jnp.bfloat16), w3_ref[...], preferred_element_type=jnp.float32)
    logits = logits + b3_ref[...]
    # numerically stable softmax along the last dim (exact divide; denom is only (tile,1))
    m = jnp.max(logits, axis=-1, keepdims=True)
    e = jnp.exp(logits - m)
    denom = jnp.sum(e, axis=-1, keepdims=True)
    o_ref[...] = (e / denom).astype(o_ref.dtype)


@functools.partial(jax.jit, static_argnames=("batch_tile",))
def policy_network_forward(x, params, batch_tile=4096):
    """x: [B, input_size] float32. params: dict of w1,b1,w2,b2,w3,b3 (weights stored as
    [in_features, out_features], i.e. already transposed vs PyTorch; weights may be f32 or
    pre-cast bf16 via prepare_params)."""
    w1, b1 = params["w1"], params["b1"]
    w2, b2 = params["w2"], params["b2"]
    w3, b3 = params["w3"], params["b3"]

    B, in_f = x.shape
    hid = w1.shape[1]
    out_f = w3.shape[1]

    # --- batch tile selection ---
    # Small batches collapse to a single grid step; large batches use big tiles (fewer
    # ~0.35us grid steps, roofline-sized DMAs). For large batches cap the tile so the
    # "parallel" axis has >= 4 steps (v7x 2-TC sharding + pipelining), but never below
    # 512 rows per tile.
    tile = min(_round_up(batch_tile, 8), _round_up(B, 8))
    if B >= 1024:
        tile = min(tile, max(512, _round_up(pl.cdiv(B, 4), 8)))
    Bp = _round_up(B, tile)
    if Bp != B:
        x = jnp.pad(x, ((0, Bp - B), (0, 0)))
    grid = (Bp // tile,)

    # bf16 MXU weights (no-op converts if params were prepared once via prepare_params)
    w1b = w1.astype(jnp.bfloat16)
    w2b = w2.astype(jnp.bfloat16)
    w3b = w3.astype(jnp.bfloat16)

    def x_map(i):
        return (i, 0)

    def full_map(i):
        return (0, 0)

    out = pl.pallas_call(
        policy_mlp_kernel,
        out_shape=jax.ShapeDtypeStruct((Bp, out_f), jnp.float32),
        grid_spec=pltpu.PrefetchScalarGridSpec(
            num_scalar_prefetch=0,
            grid=grid,
            in_specs=[
                pl.BlockSpec((tile, in_f), x_map),     # x tile (f32; cast to bf16 in-kernel)
                pl.BlockSpec((in_f, hid), full_map),   # w1 (resident)
                pl.BlockSpec((1, hid), full_map),      # b1
                pl.BlockSpec((hid, hid), full_map),    # w2
                pl.BlockSpec((1, hid), full_map),      # b2
                pl.BlockSpec((hid, out_f), full_map),  # w3
                pl.BlockSpec((1, out_f), full_map),    # b3
            ],
            out_specs=pl.BlockSpec((tile, out_f), x_map),
        ),
        compiler_params=pltpu.CompilerParams(
            dimension_semantics=("parallel",),  # batch axis shards across v7x's 2 TCs
        ),
    )(x, w1b, b1, w2b, b2, w3b, b3)

    # strip batch padding (only if any was added); no column slice needed anymore
    return out[:B] if Bp != B else out


def init_params(key, input_size, output_size, hidden=64):
    """Deterministic f32 init mirroring nn.Linear's U(-1/sqrt(fan_in), 1/sqrt(fan_in))."""
    ks = jax.random.split(key, 6)

    def linear(kw, kb, fan_in, fan_out):
        bound = 1.0 / jnp.sqrt(fan_in)
        w = jax.random.uniform(kw, (fan_in, fan_out), jnp.float32, -bound, bound)
        b = jax.random.uniform(kb, (1, fan_out), jnp.float32, -bound, bound)
        return w, b

    w1, b1 = linear(ks[0], ks[1], input_size, hidden)
    w2, b2 = linear(ks[2], ks[3], hidden, hidden)
    w3, b3 = linear(ks[4], ks[5], hidden, output_size)
    return {"w1": w1, "b1": b1, "w2": w2, "b2": b2, "w3": w3, "b3": b3}


def prepare_params(params):
    """One-time weight prep: cast the matmul weights to bf16 (biases stay f32) so the
    per-call dispatch path is a single fused kernel with no convert ops."""
    p = dict(params)
    for k in ("w1", "w2", "w3"):
        p[k] = p[k].astype(jnp.bfloat16)
    return p


if __name__ == "__main__":
    key = jax.random.PRNGKey(0)
    k_params, k_x, k_big = jax.random.split(key, 3)

    batch, input_size, output_size = 8, 32, 8
    params = init_params(k_params, input_size, output_size)
    fast_params = prepare_params(params)
    x = jax.random.normal(k_x, (batch, input_size), jnp.float32)

    probs = jax.block_until_ready(policy_network_forward(x, fast_params))
    assert probs.shape == (batch, output_size)

    # softmax rows sum to 1 (exact divide -> tight tolerance)
    row_sums = jnp.sum(probs, axis=-1)
    assert bool(jnp.all(jnp.abs(row_sums - 1.0) < 1e-5))

    # reference that mirrors the kernel's bf16-matmul / f32-accumulate numerics
    def ref_bf16(x, p):
        xb = x.astype(jnp.bfloat16)
        w1b = p["w1"].astype(jnp.bfloat16)
        w2b = p["w2"].astype(jnp.bfloat16)
        w3b = p["w3"].astype(jnp.bfloat16)
        h1 = jnp.maximum(jnp.dot(xb, w1b, preferred_element_type=jnp.float32) + p["b1"], 0.0)
        h2 = jnp.maximum(
            jnp.dot(h1.astype(jnp.bfloat16), w2b, preferred_element_type=jnp.float32) + p["b2"], 0.0
        )
        logits = jnp.dot(h2.astype(jnp.bfloat16), w3b, preferred_element_type=jnp.float32) + p["b3"]
        return jax.nn.softmax(logits, axis=-1)

    assert bool(jnp.all(jnp.abs(probs - ref_bf16(x, params)) < 1e-3))

    # full-f32 sanity check against the original module's math (looser: bf16 MXU inputs)
    def ref_f32(x, p):
        h1 = jnp.maximum(x @ p["w1"] + p["b1"], 0.0)
        h2 = jnp.maximum(h1 @ p["w2"] + p["b2"], 0.0)
        return jax.nn.softmax(h2 @ p["w3"] + p["b3"], axis=-1)

    assert bool(jnp.all(jnp.abs(probs - ref_f32(x, params)) < 5e-2))

    # exercise the multi-step / padded path: B=3000 -> tile=752, grid=(4,), padded to 3008
    x_big = jax.random.normal(k_big, (3000, input_size), jnp.float32)
    probs_big = jax.block_until_ready(policy_network_forward(x_big, fast_params))
    assert probs_big.shape == (3000, output_size)
    assert bool(jnp.all(jnp.abs(jnp.sum(probs_big, axis=-1) - 1.0) < 1e-5))

    print("KERNEL_OK")
</pallas_src>

<mosaic_0001>
module attributes {stable_mosaic.version = 11 : i64} {
  func.func @policy_mlp_kernel(%arg0: i32, %arg1: memref<8x32xf32, #tpu.memory_space<vmem>>, %arg2: memref<32x64xbf16, #tpu.memory_space<vmem>>, %arg3: memref<1x64xf32, #tpu.memory_space<vmem>>, %arg4: memref<64x64xbf16, #tpu.memory_space<vmem>>, %arg5: memref<1x64xf32, #tpu.memory_space<vmem>>, %arg6: memref<64x8xbf16, #tpu.memory_space<vmem>>, %arg7: memref<1x8xf32, #tpu.memory_space<vmem>>, %arg8: memref<8x8xf32, #tpu.memory_space<vmem>>) attributes {dimension_semantics = [#tpu.dimension_semantics<parallel>], iteration_bounds = array<i64: 1>, scalar_prefetch = 0 : i64, scratch_operands = 0 : i64, tpu.core_type = #tpu.core_type<tc>, window_params = [{transform_indices = @transform_0, window_bounds = array<i64: 8, 32>}, {pipeline_mode = #tpu.pipeline_mode<synchronous>, transform_indices = @transform_1, window_bounds = array<i64: 32, 64>}, {pipeline_mode = #tpu.pipeline_mode<synchronous>, transform_indices = @transform_2, window_bounds = array<i64: 1, 64>}, {pipeline_mode = #tpu.pipeline_mode<synchronous>, transform_indices = @transform_3, window_bounds = array<i64: 64, 64>}, {pipeline_mode = #tpu.pipeline_mode<synchronous>, transform_indices = @transform_4, window_bounds = array<i64: 1, 64>}, {pipeline_mode = #tpu.pipeline_mode<synchronous>, transform_indices = @transform_5, window_bounds = array<i64: 64, 8>}, {pipeline_mode = #tpu.pipeline_mode<synchronous>, transform_indices = @transform_6, window_bounds = array<i64: 1, 8>}, {transform_indices = @transform_7, window_bounds = array<i64: 8, 8>}]} {
    %c0 = arith.constant 0 : index
    %c0_0 = arith.constant 0 : index
    %0 = vector.load %arg1[%c0, %c0_0] : memref<8x32xf32, #tpu.memory_space<vmem>>, vector<8x32xf32>
    %1 = arith.truncf %0 : vector<8x32xf32> to vector<8x32xbf16>
    %c0_1 = arith.constant 0 : index
    %c0_2 = arith.constant 0 : index
    %2 = vector.load %arg2[%c0_1, %c0_2] : memref<32x64xbf16, #tpu.memory_space<vmem>>, vector<32x64xbf16>
    %cst = arith.constant dense<0.000000e+00> : vector<8x64xf32>
    %3 = tpu.matmul %1, %2, %cst {dimension_numbers = #tpu.dot_dimension_numbers<[1], [0], [0], [1], [0, 0, 1, 1], [], []>} : vector<8x32xbf16>, vector<32x64xbf16>, vector<8x64xf32> -> vector<8x64xf32>
    %c0_3 = arith.constant 0 : index
    %c0_4 = arith.constant 0 : index
    %4 = vector.load %arg3[%c0_3, %c0_4] : memref<1x64xf32, #tpu.memory_space<vmem>>, vector<1x64xf32>
    %5 = vector.broadcast %4 : vector<1x64xf32> to vector<8x64xf32>
    %6 = arith.addf %3, %5 : vector<8x64xf32>
    %cst_5 = arith.constant 0.000000e+00 : f32
    %7 = vector.broadcast %cst_5 : f32 to vector<8x64xf32>
    %8 = arith.maximumf %6, %7 : vector<8x64xf32>
    %9 = arith.truncf %8 : vector<8x64xf32> to vector<8x64xbf16>
    %c0_6 = arith.constant 0 : index
    %c0_7 = arith.constant 0 : index
    %10 = vector.load %arg4[%c0_6, %c0_7] : memref<64x64xbf16, #tpu.memory_space<vmem>>, vector<64x64xbf16>
    %cst_8 = arith.constant dense<0.000000e+00> : vector<8x64xf32>
    %11 = tpu.matmul %9, %10, %cst_8 {dimension_numbers = #tpu.dot_dimension_numbers<[1], [0], [0], [1], [0, 0, 1, 1], [], []>} : vector<8x64xbf16>, vector<64x64xbf16>, vector<8x64xf32> -> vector<8x64xf32>
    %c0_9 = arith.constant 0 : index
    %c0_10 = arith.constant 0 : index
    %12 = vector.load %arg5[%c0_9, %c0_10] : memref<1x64xf32, #tpu.memory_space<vmem>>, vector<1x64xf32>
    %13 = vector.broadcast %12 : vector<1x64xf32> to vector<8x64xf32>
    %14 = arith.addf %11, %13 : vector<8x64xf32>
    %cst_11 = arith.constant 0.000000e+00 : f32
    %15 = vector.broadcast %cst_11 : f32 to vector<8x64xf32>
    %16 = arith.maximumf %14, %15 : vector<8x64xf32>
    %17 = arith.truncf %16 : vector<8x64xf32> to vector<8x64xbf16>
    %c0_12 = arith.constant 0 : index
    %c0_13 = arith.constant 0 : index
    %18 = vector.load %arg6[%c0_12, %c0_13] : memref<64x8xbf16, #tpu.memory_space<vmem>>, vector<64x8xbf16>
    %cst_14 = arith.constant dense<0.000000e+00> : vector<8x8xf32>
    %19 = tpu.matmul %17, %18, %cst_14 {dimension_numbers = #tpu.dot_dimension_numbers<[1], [0], [0], [1], [0, 0, 1, 1], [], []>} : vector<8x64xbf16>, vector<64x8xbf16>, vector<8x8xf32> -> vector<8x8xf32>
    %c0_15 = arith.constant 0 : index
    %c0_16 = arith.constant 0 : index
    %20 = vector.load %arg7[%c0_15, %c0_16] : memref<1x8xf32, #tpu.memory_space<vmem>>, vector<1x8xf32>
    %21 = vector.broadcast %20 : vector<1x8xf32> to vector<8x8xf32>
    %22 = arith.addf %19, %21 : vector<8x8xf32>
    %cst_17 = arith.constant dense<0xFF800000> : vector<8xf32>
    %23 = vector.multi_reduction <maximumf>, %22, %cst_17 [1] : vector<8x8xf32> to vector<8xf32>
    %24 = vector.shape_cast %23 : vector<8xf32> to vector<8x1xf32>
    %25 = vector.broadcast %24 : vector<8x1xf32> to vector<8x8xf32>
    %26 = arith.subf %22, %25 : vector<8x8xf32>
    %27 = math.exp %26 : vector<8x8xf32>
    %cst_18 = arith.constant dense<0.000000e+00> : vector<8xf32>
    %28 = vector.multi_reduction <add>, %27, %cst_18 [1] : vector<8x8xf32> to vector<8xf32>
    %29 = vector.shape_cast %28 : vector<8xf32> to vector<8x1xf32>
    %30 = vector.broadcast %29 : vector<8x1xf32> to vector<8x8xf32>
    %31 = arith.divf %27, %30 : vector<8x8xf32>
    %c0_19 = arith.constant 0 : index
    %c0_20 = arith.constant 0 : index
    %32 = vector.load %arg8[%c0_19, %c0_20] : memref<8x8xf32, #tpu.memory_space<vmem>>, vector<8x8xf32>
    tpu.vector_store %arg8[%c0_19, %c0_20], %31 {strides = array<i32>} : memref<8x8xf32, #tpu.memory_space<vmem>>, vector<8x8xf32>,
    return
  }
  func.func @transform_0(%arg0: i32) -> (i32, i32) {
    %c0_i32 = arith.constant 0 : i32
    %c0_i32_0 = arith.constant 0 : i32
    return %arg0, %c0_i32 : i32, i32
  }
  func.func @transform_1(%arg0: i32) -> (i32, i32) {
    %c0_i32 = arith.constant 0 : i32
    %c0_i32_0 = arith.constant 0 : i32
    %c0_i32_1 = arith.constant 0 : i32
    return %c0_i32, %c0_i32_0 : i32, i32
  }
  func.func @transform_2(%arg0: i32) -> (i32, i32) {
    %c0_i32 = arith.constant 0 : i32
    %c0_i32_0 = arith.constant 0 : i32
    %c0_i32_1 = arith.constant 0 : i32
    return %c0_i32, %c0_i32_0 : i32, i32
  }
  func.func @transform_3(%arg0: i32) -> (i32, i32) {
    %c0_i32 = arith.constant 0 : i32
    %c0_i32_0 = arith.constant 0 : i32
    %c0_i32_1 = arith.constant 0 : i32
    return %c0_i32, %c0_i32_0 : i32, i32
  }
  func.func @transform_4(%arg0: i32) -> (i32, i32) {
    %c0_i32 = arith.constant 0 : i32
    %c0_i32_0 = arith.constant 0 : i32
    %c0_i32_1 = arith.constant 0 : i32
    return %c0_i32, %c0_i32_0 : i32, i32
  }
  func.func @transform_5(%arg0: i32) -> (i32, i32) {
    %c0_i32 = arith.constant 0 : i32
    %c0_i32_0 = arith.constant 0 : i32
    %c0_i32_1 = arith.constant 0 : i32
    return %c0_i32, %c0_i32_0 : i32, i32
  }
  func.func @transform_6(%arg0: i32) -> (i32, i32) {
    %c0_i32 = arith.constant 0 : i32
    %c0_i32_0 = arith.constant 0 : i32
    %c0_i32_1 = arith.constant 0 : i32
    return %c0_i32, %c0_i32_0 : i32, i32
  }
  func.func @transform_7(%arg0: i32) -> (i32, i32) {
    %c0_i32 = arith.constant 0 : i32
    %c0_i32_0 = arith.constant 0 : i32
    return %arg0, %c0_i32 : i32, i32
  }
}

</mosaic_0001>

<bundles_post_ra>
// kernel: policy_network_forward.1
= control target key start
LH: loop header
LB: loop body
LE: loop exit
PB: predicated region body
PF: predicated region fallthrough
CT: control target
= control target key end

     0   :  { %12 = vsyncpa [#allocation3], 0  ;;  %s548_s0 = inlined_call_operand.hbm [shape: f32[8,32], index: 0, kind: input, shape index: {}]   ;;  %s549_s1 = inlined_call_operand.vmem [shape: bf16[32,64], index: 1, kind: input, shape index: {}]   ;;  %s550_s2 = inlined_call_operand.vmem [shape: f32[1,64], index: 2, kind: input, shape index: {}]   ;;  %s551_s3 = inlined_call_operand.vmem [shape: bf16[64,64], index: 3, kind: input, shape index: {}]   ;;  %s552_s4 = inlined_call_operand.vmem [shape: f32[1,64], index: 4, kind: input, shape index: {}]   ;;  %s553_s5 = inlined_call_operand.vmem [shape: bf16[64,8], index: 5, kind: input, shape index: {}]   ;;  %s554_s6 = inlined_call_operand.vmem [shape: f32[1,8], index: 6, kind: input, shape index: {}]   ;;  %s555_s7 = inlined_call_operand.hbm [shape: f32[8,8], index: 7, kind: output, shape index: {}]  }
   0x1   :  { %13 = vsyncpa [#allocation4], 0  ;;  %s433_s24 = smov [#allocation2]   ;;  %s385_s28 = scalar_lea.hbm %s548_s0, 128 }
   0x2   :  { %s20_s25 = sshll.u32 %s433_s24, 4  ;;  %p386_p0 = scmp.ne.s32.totalorder %s548_s0, %s385_s28  ;;  %s21_s25 = int_to_ptr.vmem [resolvable:$true] %s20_s25 }
   0x3   :  { %p389_p1 = scmp.lt.u32.totalorder %s385_s28, %s548_s0 }
   0x5   :  { %p391_p2 = pnand %p389_p1, %p386_p0 }
   0x7   :  { %394 = shalt.err (!%p391_p2)
}
   0x8   :  { %s395_s10 = scalar_lea.vmem %s21_s25, 128  ;;  %p400_p4 = scmp.lt.s32.totalorder %s21_s25, %s21_s25 }
   0x9   :  { %p396_p3 = scmp.ne.s32.totalorder %s21_s25, %s395_s10  ;;  %p401_p5 = scmp.lt.s32.totalorder %s395_s10, %s395_s10 }
   0xb   :  { %p402_p6 = por %p401_p5, %p400_p4 }
   0xd   :  { %p403_p7 = pnand %p402_p6, %p396_p3 }
   0xf   :  { %406 = shalt.err (!%p403_p7)
}
  0x10   :  { %23 = dma.hbm_to_vmem [thread:$0]  %s548_s0, 128, %s21_s25, [#allocation3]  }
  0x11   :  { %429 = dma.done.wait [#allocation3], 128  }
  0x12   :  { %430 = vsyncadd [#allocation3], 4294967168  ;;  %v434_v0 = vmov 0.0   ;;  %vm435_vm0 = vmmov 0   ;;  %v371_v1 = vld [vmem:[%s549_s1] sm:$0xff]   ;;  %v372_v2 = vld [vmem:[%s549_s1 + $0x8] sm:$0xff]  }
  0x13   :  { %335 = vmatprep.subr.bf16.mxu0 %v434_v0  ;;  %339 = vmatprep.mubr.msk.bf16.mxu0 %vm435_vm0, %v434_v0  ;;  %v40_v3 = vld [vmem:[#allocation2] sm:$0xff]  ;;  %vm65_vm1 = vcmask 261120   ;;  %v374_v5 = vld [vmem:[%s551_s3 + $0x8] sm:$0xff]   ;;  %v375_v7 = vld [vmem:[%s551_s3 + $0x10] sm:$0xff]   ;;  %vm150_vm2 = vcmask 523264   ;;  %vm278_vm3 = vcmask 64512  }
  0x14   :  { %343 = vmatprep.subr.bf16.mxu1 %v434_v0  ;;  %351 = vmatprep.mubr.msk.bf16.mxu1 %vm435_vm0, %v434_v0  ;;  %v373_v4 = vld [vmem:[%s551_s3] sm:$0xff]   ;;  %v41_v6 = vpack.c.bf16 %v40_v3, %v40_v3  ;;  %v376_v8 = vld [vmem:[%s551_s3 + $0x18] sm:$0xff]   ;;  %v378_v10 = vld [vmem:[%s553_s5 + $0x8] sm:$0xff]  }
  0x15   :  { %336 = vmatpush3.bf16.msra.mxu0 %v371_v1  ;;  %344 = vmatpush3.bf16.msra.mxu1 %v373_v4  ;;  %v377_v9 = vld [vmem:[%s553_s5] sm:$0xff]   ;;  %v379_v19 = vld [vmem:[%s553_s5 + $0x10] sm:$0xff]   ;;  %v380_v20 = vld [vmem:[%s553_s5 + $0x18] sm:$0xff]  }
  0x16   :  { %337 = vmatprep.subr.bf16.mxu0 %v434_v0  ;;  %345 = vmatprep.subr.bf16.mxu1 %v434_v0  ;;  %v306_v11 = vld [vmem:[%s550_s2] ss:$0 sm:$0xff] }
  0x17   :  { %v310_v21 = vld [vmem:[%s552_s4] ss:$0 sm:$0xff]  ;;  %s436_s4 = smov [#allocation5]  }
  0x18   :  { %v316_v29 = vld [vmem:[%s554_s6] ss:$0 sm:$0xff]  ;;  %s297_s5 = sshll.u32 %s436_s4, 4  ;;  %s298_s5 = int_to_ptr.vmem [resolvable:$true] %s297_s5 }
  0x19   :  { %338 = vmatpush3.bf16.msra.mxu0 %v372_v2  ;;  %346 = vmatpush3.bf16.msra.mxu1 %v374_v5  ;;  %s407_s6 = scalar_lea.vmem %s298_s5, 128  ;;  %p412_p9 = scmp.lt.s32.totalorder %s298_s5, %s298_s5 }
  0x1a   :  { %355 = vmatprep.subr.bf16.mxu0 %v434_v0  ;;  %347 = vmatprep.subr.bf16.mxu1 %v434_v0  ;;  %p408_p8 = scmp.ne.s32.totalorder %s298_s5, %s407_s6  ;;  %p413_p10 = scmp.lt.s32.totalorder %s407_s6, %s407_s6 }
  0x1c   :  { %340 = vmatmul.mubr.msk.bf16.vlgmr.msra.gmra.mrb[0].mxu0 %vm65_vm1, %v41_v6  ;;  %p414_p11 = por %p413_p10, %p412_p9 }
  0x1d   :  { %363 = vmatprep.mubr.msk.bf16.mxu0 %vm435_vm0, %v434_v0  ;;  %348 = vmatpush3.bf16.msra.mxu1 %v375_v7 }
  0x1e   :  { %349 = vmatprep.subr.bf16.mxu1 %v434_v0  ;;  %356 = vmatpush3.bf16.msra.mxu0 %v377_v9  ;;  %p415_p12 = pnand %p414_p11, %p408_p8 }
  0x1f   :  { %357 = vmatprep.subr.bf16.mxu0 %v434_v0 }
  0x21   :  { %350 = vmatpush3.bf16.msra.mxu1 %v376_v8 }
  0x22   :  { %358 = vmatpush3.bf16.msra.mxu0 %v378_v10 }
  0x23   :  { %359 = vmatprep.subr.bf16.mxu0 %v434_v0 }
  0x26   :  { %360 = vmatpush3.bf16.msra.mxu0 %v379_v19 }
  0x27   :  { %361 = vmatprep.subr.bf16.mxu0 %v434_v0 }
  0x2a   :  { %362 = vmatpush3.bf16.msra.mxu0 %v380_v20 }
  0xef   :  { %v103_v12 = vpop.f32.mrb[0].mxu0 }
  0xf0   :  { %v104_v13 = vadd.f32 %v306_v11, %v103_v12  ;;  %v341_v14 = vpop.f32.mrb[1].mxu0 }
  0xf1   :  { %v106_v15 = vpop.f32.mrb[2].mxu0 }
  0xf2   :  { %v109_v16 = vmax.f32 %v104_v13, 0.0  ;;  %v342_v17 = vpop.f32.mrb[3].mxu0 }
  0xf4   :  { %v110_v18 = vpack.c.bf16 %v109_v16, %v109_v16 }
  0xf6   :  { %352 = vmatmul.mubr.msk.bf16.vlgmr.msra.gmra.mrb[0].mxu1 %vm150_vm2, %v110_v18 }
 0x1c9   :  { %v188_v22 = vpop.f32.mrb[0].mxu1 }
 0x1ca   :  { %v189_v23 = vadd.f32 %v310_v21, %v188_v22  ;;  %v353_v24 = vpop.f32.mrb[1].mxu1 }
 0x1cb   :  { %v191_v25 = vpop.f32.mrb[2].mxu1 }
 0x1cc   :  { %v194_v26 = vmax.f32 %v189_v23, 0.0  ;;  %v354_v27 = vpop.f32.mrb[3].mxu1 }
 0x1ce   :  { %v195_v28 = vpack.c.bf16 %v194_v26, %v194_v26 }
 0x1d0   :  { %364 = vmatmul.mubr.msk.bf16.vlgmr.msra.gmra.mrb[4].mxu0 %vm150_vm2, %v195_v28 }
 0x2a3   :  { %v272_v30 = vpop.f32.mrb[4].mxu0 }
 0x2a4   :  { %v273_v31 = vadd.f32 %v316_v29, %v272_v30  ;;  %v365_v32 = vpop.f32.mrb[5].mxu0 }
 0x2a5   :  { %v275_v33 = vpop.f32.mrb[6].mxu0 }
 0x2a6   :  { %v366_v34 = vpop.f32.mrb[7].mxu0  ;;  %v279_v35 = vsel %vm278_vm3, %v273_v31, -inf }
 0x2a7   :  { %280 = vmax.xlane.f32.xlu0 %v279_v35 }
 0x334   :  { %v281_v36 = vpop.xlane.xlu0 %280 }
 0x335   :  { %v282_v37 = vsub.f32 %v273_v31, %v281_v36 }
 0x337   :  { %v283_v38 = vmul.f32 1.442695, %v282_v37 }
 0x339   :  { %381 = vpow2.f32 %v283_v38 }
 0x343   :  { %v382_v39 = vpop.eup %381 }
 0x344   :  { %v285_v40 = vsel %vm278_vm3, %v382_v39, 0.0 }
 0x345   :  { %286 = vadd.xlane.f32.xlu0 %v285_v40 }
 0x3d2   :  { %v287_v41 = vpop.xlane.xlu0 %286 }
 0x3d3   :  { %383 = vrcp.f32 %v287_v41 }
 0x3dd   :  { %v384_v42 = vpop.eup %383 }
 0x3de   :  { %v289_v43 = vmul.f32 %v384_v42, %v382_v39 }
 0x3e0   :  { %290 = vst.msk [vmem:[#allocation5] sm:$0xff] %vm278_vm3, %v289_v43 }
 0x3e1   :  { %418 = shalt.err (!%p415_p12)
}
 0x3e2   :  { %s419_s14 = scalar_lea.hbm %s555_s7, 128 }
 0x3e3   :  { %p420_p13 = scmp.ne.s32.totalorder %s555_s7, %s419_s14  ;;  %p423_p0 = scmp.lt.u32.totalorder %s419_s14, %s555_s7 }
 0x3e5   :  { %p425_p1 = pnand %p423_p0, %p420_p13 }
 0x3e7   :  { %428 = shalt.err (!%p425_p1)
}
 0x3e8   :  { %300 = dma.vmem_to_hbm [thread:$0]  %s298_s5, 128, %s555_s7, [#allocation4]  }
 0x3e9   :  { %431 = dma.done.wait [#allocation4], 128  }
 0x3ea   :  { %432 = vsyncadd [#allocation4], 4294967168 }
 0x3eb   :  { %304 = vsyncpa [#allocation3], 1 }
 0x3ec   :  { %305 = vsyncpa [#allocation4], 1 }

</bundles_post_ra>
